<compile_context>
chip_gen: v5e
topology: v5e:2x2
jax: 0.10.0
libtpu: 0.0.40
codegen_flags: <defaults>
</compile_context>

<pallas_src>
import functools

import jax
import jax.numpy as jnp
from jax.experimental import pallas as pl
from jax.experimental.pallas import tpu as pltpu


def _rnn_seq_kernel(noise_value,      # static python float
                    noise_mode,       # static: "none" | "prng" | "input"
                    seed_ref,         # SMEM (1,)  int32  (read only in "prng" mode)
                    x_ref,            # VMEM (1, B, D_in)     timestep-t slice
                    h0_ref,           # VMEM (B, H)           initial hidden (read at t==0)
                    w_cat_ref,        # VMEM (D_in + H, H)    [W_i2h.T ; W_h2h.T]
                    bh_ref,           # VMEM (1, H)           b_h2h
                    wo_ref,           # VMEM (H, O)           W_h2o.T
                    *rest):
    if noise_mode == "input":
        noise_ref, out_ref, hid_ref, xh_acc = rest   # noise_ref: VMEM (1, B, H)
    else:
        out_ref, hid_ref, xh_acc = rest
    # out_ref: VMEM (1, B, O); hid_ref: VMEM (1, B, H)
    # xh_acc : VMEM (B, D_in + H) scratch -- persists across grid steps.

    t = pl.program_id(0)
    d_in = x_ref.shape[2]

    @pl.when(t == 0)
    def _init():
        # Seed the recurrent carry with h0 (and the HW PRNG, once).
        xh_acc[:, d_in:] = h0_ref[...]
        if noise_mode == "prng":
            pltpu.prng_seed(seed_ref[0])

    # Current input goes into the first D_in lanes of the fused activation so a
    # single MXU matmul covers both i2h and h2h (plus the bias add).
    xh_acc[:, :d_in] = x_ref[0]

    combined = (
        jnp.dot(xh_acc[...], w_cat_ref[...], preferred_element_type=jnp.float32)
        + bh_ref[...]
    )

    if noise_mode == "prng":
        # Fresh Gaussian draw every timestep (std = noise_value).
        noise = pltpu.stateful_normal(combined.shape, jnp.float32)
        combined = combined + noise * jnp.float32(noise_value)
    elif noise_mode == "input":
        combined = combined + noise_ref[0]

    hidden = jnp.tanh(combined)

    # Carry hidden state into the next grid step and emit it.
    xh_acc[:, d_in:] = hidden
    hid_ref[0] = hidden.astype(hid_ref.dtype)

    logits = jnp.dot(hidden, wo_ref[...], preferred_element_type=jnp.float32)
    out_ref[0] = jax.nn.sigmoid(logits).astype(out_ref.dtype)


def prepare_params(w_i2h, w_h2h, b_h2h, w_h2o):
    """One-time parameter prep (hoisted out of the per-forward path).

    w_i2h: (H, D_in)   PyTorch Linear weight layout (out, in)
    w_h2h: (H, H)
    b_h2h: (H,)
    w_h2o: (O, H)
    Returns (w_cat (D_in+H, H), bh (1, H), wo_t (H, O)).
    """
    w_i2h = jnp.asarray(w_i2h, jnp.float32)
    w_h2h = jnp.asarray(w_h2h, jnp.float32)
    h_dim = w_i2h.shape[0]
    w_cat = jnp.concatenate([w_i2h.T, w_h2h.T], axis=0)        # (D_in + H, H)
    bh = jnp.asarray(b_h2h, jnp.float32).reshape(1, h_dim)      # (1, H)
    wo_t = jnp.asarray(w_h2o, jnp.float32).T                    # (H, O)
    return w_cat, bh, wo_t


def custom_rnn_sequence(xs, h0, params, noise_value=0.0, seed=0):
    """Runs T CustomRNN steps in one pallas_call.

    xs: (T, B, D_in) float32, h0: (B, H) float32, params from prepare_params().
    Returns (outputs (T, B, O), hiddens (T, B, H)) -- identical to calling the
    PyTorch module's forward T times while threading the hidden state.

    NOTE: noise_value is a static Python float (distinct values recompile).
    """
    w_cat, bh, wo_t = params
    T, B, D_in = xs.shape
    H = bh.shape[1]
    O = wo_t.shape[1]
    assert w_cat.shape == (D_in + H, H)

    noise_mode = "none"
    if float(noise_value) != 0.0:
        noise_mode = "prng" if jax.default_backend() == "tpu" else "input"

    kernel = functools.partial(_rnn_seq_kernel, float(noise_value), noise_mode)

    seed_arr = jnp.asarray([seed], jnp.int32)

    in_specs = [
        pl.BlockSpec(memory_space=pltpu.MemorySpace.SMEM),         # seed (scalar)
        pl.BlockSpec((1, B, D_in), lambda t: (t, 0, 0)),           # x_t (streamed)
        pl.BlockSpec((B, H), lambda t: (0, 0)),                    # h0  (resident)
        pl.BlockSpec((D_in + H, H), lambda t: (0, 0)),             # fused weight (resident)
        pl.BlockSpec((1, H), lambda t: (0, 0)),                    # bias (resident)
        pl.BlockSpec((H, O), lambda t: (0, 0)),                    # W_h2o.T (resident)
    ]
    inputs = [
        seed_arr,
        jnp.asarray(xs, jnp.float32),
        jnp.asarray(h0, jnp.float32),
        w_cat, bh, wo_t,
    ]

    if noise_mode == "input":
        # TODO(synk): host-side noise exists only because pltpu.prng_* has no
        # CPU/interpret lowering; on a real TPU backend the in-kernel PRNG path
        # above is taken instead (noise generation rides free EUP/VPU slots).
        noise = noise_value * jax.random.normal(
            jax.random.PRNGKey(seed), (T, B, H), dtype=jnp.float32)
        in_specs.append(pl.BlockSpec((1, B, H), lambda t: (t, 0, 0)))
        inputs.append(noise)

    # TODO(synk): outputs (B, O=8) / (B, H=32) are lane-sparse (<128); padding
    # O/H to 128 or slab-accumulating timesteps would make writeback lane-dense
    # but is left out at these tiny sizes.
    out, hid = pl.pallas_call(
        kernel,
        grid=(T,),
        out_shape=(
            jax.ShapeDtypeStruct((T, B, O), jnp.float32),
            jax.ShapeDtypeStruct((T, B, H), jnp.float32),
        ),
        in_specs=in_specs,
        out_specs=(
            pl.BlockSpec((1, B, O), lambda t: (t, 0, 0)),
            pl.BlockSpec((1, B, H), lambda t: (t, 0, 0)),
        ),
        scratch_shapes=[pltpu.VMEM((B, D_in + H), jnp.float32)],   # [x_t | h] carry
        compiler_params=pltpu.CompilerParams(
            dimension_semantics=("arbitrary",)),  # recurrent carry over time
    )(*inputs)
    return out, hid


def custom_rnn_forward(x, h_prev, params, noise_value=0.0, seed=0):
    """Single step, exactly matching CustomRNN.forward.  Returns (output, hidden)."""
    out, hid = custom_rnn_sequence(x[None], h_prev, params,
                                   noise_value=noise_value, seed=seed)
    return out[0], hid[0]


def _reference_sequence(xs, h0, w_i2h, w_h2h, b_h2h, w_h2o, noise=None):
    """Pure-JAX reference: the PyTorch forward applied step by step."""
    outs, hids = [], []
    h = h0
    for t in range(xs.shape[0]):
        combined = xs[t] @ w_i2h.T + h @ w_h2h.T + b_h2h
        if noise is not None:
            combined = combined + noise[t]
        h = jnp.tanh(combined)
        outs.append(jax.nn.sigmoid(h @ w_h2o.T))
        hids.append(h)
    return jnp.stack(outs), jnp.stack(hids)


if __name__ == "__main__":
    # Small shapes consistent with the module's forward.
    B, D_in, H, O, T = 8, 16, 32, 8, 12

    key = jax.random.PRNGKey(0)
    k_x, k_h, k_wi, k_wh, k_bh, k_wo = jax.random.split(key, 6)

    xs = jax.random.normal(k_x, (T, B, D_in), dtype=jnp.float32)
    # init_hidden -> zeros; perturb slightly for a stronger correctness check.
    h0 = 0.1 * jax.random.normal(k_h, (B, H), dtype=jnp.float32)

    # PyTorch Linear weight layout: (out_features, in_features).
    w_i2h = 0.2 * jax.random.normal(k_wi, (H, D_in), dtype=jnp.float32)
    w_h2h = 0.2 * jax.random.normal(k_wh, (H, H), dtype=jnp.float32)
    b_h2h = 0.1 * jax.random.normal(k_bh, (H,), dtype=jnp.float32)
    w_h2o = 0.2 * jax.random.normal(k_wo, (O, H), dtype=jnp.float32)

    # One-time weight prep (hoisted out of the per-forward path).
    params = prepare_params(w_i2h, w_h2h, b_h2h, w_h2o)

    # --- deterministic (noise_value == 0) sequence vs. pure-JAX reference ---
    outs, hids = custom_rnn_sequence(xs, h0, params, noise_value=0.0)
    jax.block_until_ready((outs, hids))
    outs_ref, hids_ref = _reference_sequence(xs, h0, w_i2h, w_h2h, b_h2h, w_h2o)
    assert outs.shape == (T, B, O) and hids.shape == (T, B, H)
    assert jnp.allclose(outs, outs_ref, atol=1e-5, rtol=1e-5)
    assert jnp.allclose(hids, hids_ref, atol=1e-5, rtol=1e-5)

    # --- single-step forward (the module's forward, verbatim semantics) ---
    out1, hid1 = custom_rnn_forward(xs[0], h0, params, noise_value=0.0)
    jax.block_until_ready((out1, hid1))
    assert out1.shape == (B, O) and hid1.shape == (B, H)
    assert jnp.allclose(out1, outs_ref[0], atol=1e-5, rtol=1e-5)
    assert jnp.allclose(hid1, hids_ref[0], atol=1e-5, rtol=1e-5)

    # --- noisy path (stochastic): shape / finiteness sanity check ---
    out_n, hid_n = custom_rnn_sequence(xs, h0, params, noise_value=0.1, seed=123)
    jax.block_until_ready((out_n, hid_n))
    assert out_n.shape == (T, B, O) and hid_n.shape == (T, B, H)
    assert bool(jnp.all(jnp.isfinite(out_n))) and bool(jnp.all(jnp.isfinite(hid_n)))

    print("KERNEL_OK")
</pallas_src>

<mosaic_0001>
module attributes {stable_mosaic.version = 11 : i64} {
  func.func @_rnn_seq_kernel(%arg0: i32, %arg1: memref<1xi32, #tpu.memory_space<smem>>, %arg2: memref<1x8x16xf32, #tpu.memory_space<vmem>>, %arg3: memref<8x32xf32, #tpu.memory_space<vmem>>, %arg4: memref<48x32xf32, #tpu.memory_space<vmem>>, %arg5: memref<1x32xf32, #tpu.memory_space<vmem>>, %arg6: memref<32x8xf32, #tpu.memory_space<vmem>>, %arg7: memref<1x8x8xf32, #tpu.memory_space<vmem>>, %arg8: memref<1x8x32xf32, #tpu.memory_space<vmem>>, %arg9: memref<8x48xf32, #tpu.memory_space<vmem>>) attributes {dimension_semantics = [#tpu.dimension_semantics<arbitrary>], iteration_bounds = array<i64: 12>, scalar_prefetch = 0 : i64, scratch_operands = 1 : i64, tpu.core_type = #tpu.core_type<tc>, window_params = [{transform_indices = @transform_0, window_bounds = array<i64: 1>}, {transform_indices = @transform_1, window_bounds = array<i64: 1, 8, 16>}, {pipeline_mode = #tpu.pipeline_mode<synchronous>, transform_indices = @transform_2, window_bounds = array<i64: 8, 32>}, {pipeline_mode = #tpu.pipeline_mode<synchronous>, transform_indices = @transform_3, window_bounds = array<i64: 48, 32>}, {pipeline_mode = #tpu.pipeline_mode<synchronous>, transform_indices = @transform_4, window_bounds = array<i64: 1, 32>}, {pipeline_mode = #tpu.pipeline_mode<synchronous>, transform_indices = @transform_5, window_bounds = array<i64: 32, 8>}, {transform_indices = @transform_6, window_bounds = array<i64: 1, 8, 8>}, {transform_indices = @transform_7, window_bounds = array<i64: 1, 8, 32>}]} {
    %c0_i32 = arith.constant 0 : i32
    %0 = arith.cmpi eq, %arg0, %c0_i32 : i32
    %1 = arith.extui %0 : i1 to i32
    %c0_i32_0 = arith.constant 0 : i32
    %2 = arith.cmpi ne, %1, %c0_i32_0 : i32
    scf.if %2 {
      %c0_22 = arith.constant 0 : index
      %c0_23 = arith.constant 0 : index
      %27 = vector.load %arg3[%c0_22, %c0_23] : memref<8x32xf32, #tpu.memory_space<vmem>>, vector<8x32xf32>
      %c0_24 = arith.constant 0 : index
      %c16_25 = arith.constant 16 : index
      %28 = vector.load %arg9[%c0_24, %c16_25] : memref<8x48xf32, #tpu.memory_space<vmem>>, vector<8x32xf32>
      tpu.vector_store %arg9[%c0_24, %c16_25], %27 {strides = array<i32>} : memref<8x48xf32, #tpu.memory_space<vmem>>, vector<8x32xf32>,
    } else {
    }
    %c0 = arith.constant 0 : index
    %c0_1 = arith.constant 0 : index
    %c0_2 = arith.constant 0 : index
    %3 = vector.load %arg2[%c0, %c0_1, %c0_2] : memref<1x8x16xf32, #tpu.memory_space<vmem>>, vector<1x8x16xf32>
    %4 = vector.shape_cast %3 : vector<1x8x16xf32> to vector<8x16xf32>
    %c0_3 = arith.constant 0 : index
    %c0_4 = arith.constant 0 : index
    %5 = vector.load %arg9[%c0_3, %c0_4] : memref<8x48xf32, #tpu.memory_space<vmem>>, vector<8x16xf32>
    tpu.vector_store %arg9[%c0_3, %c0_4], %4 {strides = array<i32>} : memref<8x48xf32, #tpu.memory_space<vmem>>, vector<8x16xf32>,
    %c0_5 = arith.constant 0 : index
    %c0_6 = arith.constant 0 : index
    %6 = vector.load %arg9[%c0_5, %c0_6] : memref<8x48xf32, #tpu.memory_space<vmem>>, vector<8x48xf32>
    %c0_7 = arith.constant 0 : index
    %c0_8 = arith.constant 0 : index
    %7 = vector.load %arg4[%c0_7, %c0_8] : memref<48x32xf32, #tpu.memory_space<vmem>>, vector<48x32xf32>
    %cst = arith.constant dense<0.000000e+00> : vector<8x32xf32>
    %8 = tpu.matmul %6, %7, %cst {dimension_numbers = #tpu.dot_dimension_numbers<[1], [0], [0], [1], [0, 0, 1, 1], [], []>} : vector<8x48xf32>, vector<48x32xf32>, vector<8x32xf32> -> vector<8x32xf32>
    %c0_9 = arith.constant 0 : index
    %c0_10 = arith.constant 0 : index
    %9 = vector.load %arg5[%c0_9, %c0_10] : memref<1x32xf32, #tpu.memory_space<vmem>>, vector<1x32xf32>
    %10 = vector.broadcast %9 : vector<1x32xf32> to vector<8x32xf32>
    %11 = arith.addf %8, %10 : vector<8x32xf32>
    %12 = math.tanh %11 : vector<8x32xf32>
    %c0_11 = arith.constant 0 : index
    %c16 = arith.constant 16 : index
    %13 = vector.load %arg9[%c0_11, %c16] : memref<8x48xf32, #tpu.memory_space<vmem>>, vector<8x32xf32>
    tpu.vector_store %arg9[%c0_11, %c16], %12 {strides = array<i32>} : memref<8x48xf32, #tpu.memory_space<vmem>>, vector<8x32xf32>,
    %c0_12 = arith.constant 0 : index
    %c0_13 = arith.constant 0 : index
    %c0_14 = arith.constant 0 : index
    %14 = vector.load %arg8[%c0_12, %c0_13, %c0_14] : memref<1x8x32xf32, #tpu.memory_space<vmem>>, vector<1x8x32xf32>
    %15 = vector.shape_cast %14 : vector<1x8x32xf32> to vector<8x32xf32>
    %16 = vector.shape_cast %12 : vector<8x32xf32> to vector<1x8x32xf32>
    tpu.vector_store %arg8[%c0_12, %c0_13, %c0_14], %16 {strides = array<i32>} : memref<1x8x32xf32, #tpu.memory_space<vmem>>, vector<1x8x32xf32>,
    %c0_15 = arith.constant 0 : index
    %c0_16 = arith.constant 0 : index
    %17 = vector.load %arg6[%c0_15, %c0_16] : memref<32x8xf32, #tpu.memory_space<vmem>>, vector<32x8xf32>
    %cst_17 = arith.constant dense<0.000000e+00> : vector<8x8xf32>
    %18 = tpu.matmul %12, %17, %cst_17 {dimension_numbers = #tpu.dot_dimension_numbers<[1], [0], [0], [1], [0, 0, 1, 1], [], []>} : vector<8x32xf32>, vector<32x8xf32>, vector<8x8xf32> -> vector<8x8xf32>
    %19 = arith.negf %18 : vector<8x8xf32>
    %20 = math.exp %19 : vector<8x8xf32>
    %cst_18 = arith.constant 1.000000e+00 : f32
    %21 = vector.broadcast %cst_18 : f32 to vector<8x8xf32>
    %22 = arith.addf %21, %20 : vector<8x8xf32>
    %23 = arith.divf %21, %22 : vector<8x8xf32>
    %c0_19 = arith.constant 0 : index
    %c0_20 = arith.constant 0 : index
    %c0_21 = arith.constant 0 : index
    %24 = vector.load %arg7[%c0_19, %c0_20, %c0_21] : memref<1x8x8xf32, #tpu.memory_space<vmem>>, vector<1x8x8xf32>
    %25 = vector.shape_cast %24 : vector<1x8x8xf32> to vector<8x8xf32>
    %26 = vector.shape_cast %23 : vector<8x8xf32> to vector<1x8x8xf32>
    tpu.vector_store %arg7[%c0_19, %c0_20, %c0_21], %26 {strides = array<i32>} : memref<1x8x8xf32, #tpu.memory_space<vmem>>, vector<1x8x8xf32>,
    return
  }
  func.func @transform_0(%arg0: i32) -> i32 {
    %c0_i32 = arith.constant 0 : i32
    %c0_i32_0 = arith.constant 0 : i32
    return %c0_i32 : i32
  }
  func.func @transform_1(%arg0: i32) -> (i32, i32, i32) {
    %c0_i32 = arith.constant 0 : i32
    %c0_i32_0 = arith.constant 0 : i32
    %c0_i32_1 = arith.constant 0 : i32
    return %arg0, %c0_i32, %c0_i32_0 : i32, i32, i32
  }
  func.func @transform_2(%arg0: i32) -> (i32, i32) {
    %c0_i32 = arith.constant 0 : i32
    %c0_i32_0 = arith.constant 0 : i32
    %c0_i32_1 = arith.constant 0 : i32
    return %c0_i32, %c0_i32_0 : i32, i32
  }
  func.func @transform_3(%arg0: i32) -> (i32, i32) {
    %c0_i32 = arith.constant 0 : i32
    %c0_i32_0 = arith.constant 0 : i32
    %c0_i32_1 = arith.constant 0 : i32
    return %c0_i32, %c0_i32_0 : i32, i32
  }
  func.func @transform_4(%arg0: i32) -> (i32, i32) {
    %c0_i32 = arith.constant 0 : i32
    %c0_i32_0 = arith.constant 0 : i32
    %c0_i32_1 = arith.constant 0 : i32
    return %c0_i32, %c0_i32_0 : i32, i32
  }
  func.func @transform_5(%arg0: i32) -> (i32, i32) {
    %c0_i32 = arith.constant 0 : i32
    %c0_i32_0 = arith.constant 0 : i32
    %c0_i32_1 = arith.constant 0 : i32
    return %c0_i32, %c0_i32_0 : i32, i32
  }
  func.func @transform_6(%arg0: i32) -> (i32, i32, i32) {
    %c0_i32 = arith.constant 0 : i32
    %c0_i32_0 = arith.constant 0 : i32
    %c0_i32_1 = arith.constant 0 : i32
    return %arg0, %c0_i32, %c0_i32_0 : i32, i32, i32
  }
  func.func @transform_7(%arg0: i32) -> (i32, i32, i32) {
    %c0_i32 = arith.constant 0 : i32
    %c0_i32_0 = arith.constant 0 : i32
    %c0_i32_1 = arith.constant 0 : i32
    return %arg0, %c0_i32, %c0_i32_0 : i32, i32, i32
  }
}

</mosaic_0001>

<bundles_post_ra>
// kernel: tpu_custom_call.1
= control target key start
LH: loop header
LB: loop body
LE: loop exit
PB: predicated region body
PF: predicated region fallthrough
CT: control target
= control target key end

     0   :  { %s916_s0 = inlined_call_operand.<no memory space> [shape: s32[1], index: 0, kind: input, shape index: {}]   ;;  %s917_s1 = inlined_call_operand.hbm [shape: f32[12,8,16], index: 1, kind: input, shape index: {}]   ;;  %s918_s2 = inlined_call_operand.vmem [shape: f32[8,32], index: 2, kind: input, shape index: {}]   ;;  %s919_s3 = inlined_call_operand.vmem [shape: f32[48,32], index: 3, kind: input, shape index: {}]   ;;  %s920_s4 = inlined_call_operand.vmem [shape: f32[1,32], index: 4, kind: input, shape index: {}]   ;;  %s921_s5 = inlined_call_operand.vmem [shape: f32[32,8], index: 5, kind: input, shape index: {}]   ;;  %s922_s6 = inlined_call_operand.vmem [shape: f32[12,8,8], index: 6, kind: output, shape index: {0}]   ;;  %s923_s7 = inlined_call_operand.hbm [shape: f32[12,8,32], index: 7, kind: output, shape index: {1}]  }
   0x1   :  { %924 = sst [smem:[#allocation10_spill]] %s917_s1 }
   0x2   :  { %14 = vsyncpa [#allocation5], 0 }
   0x3   :  { %16 = vsyncpa [#allocation5 + $0x1], 0 }
   0x4   :  { %17 = vsyncpa [#allocation6], 0 }
   0x5   :  { %19 = vsyncpa [#allocation6 + $0x1], 0  ;;  %s742_s23 = smov 0   ;;  %s744_s24 = smov 0  }
   0x6   :  { %s746_s25 = smov 0   ;;  %s748_s26 = smov 0  }
   0x7 LB: > { %s763_s27 = sadd.s32 4294967295, %s698_s26   ;;  %s530_s28 = sadd.s32 4294967294, %s698_s26   ;;  %s698_s26 = sphi %s748_s26, %s934_s26   ;;  %s694_s25 = sphi %s746_s25, %s933_s25   ;;  %s690_s24 = sphi %s744_s24, %s932_s24   ;;  %s686_s23 = sphi %s742_s23, %s931_s23  }
   0x8   : > { %s767_s29 = sadd.s32 1, %s698_s26   ;;  %s53_s30 = sadd.s32 1, %s694_s25 }
   0x9   : > { %s50_s8 = ssub.s32 %s698_s26, %s767_s29  ;;  %p60_p0 = scmp.ne.s32.totalorder %s694_s25, %s690_s24 }
   0xa   : > { %p51_p1 = scmp.eq.s32.totalorder %s50_s8, 0  ;;  %p61_p2 = scmp.eq.s32.totalorder %s698_s26, 0 }
   0xb   : > { %p66_p3 = scmp.ne.s32.totalorder %s690_s24, %s686_s23  ;;  %p67_p4 = scmp.eq.s32.totalorder %s763_s27, 0 }
   0xc   : > { %s779_s9 = scalar_select %p51_p1, %s694_s25, %s53_s30  }
   0xd   : > { %p781_p5 = por %p61_p2, %p60_p0  ;;  %p785_p6 = por %p67_p4, %p66_p3 }
   0xe   : > { %p200_p7 = scmp.eq.s32.totalorder %s763_s27, 11  ;;  %p206_p8 = scmp.eq.s32.totalorder %s530_s28, 11 }
   0xf   : > { %p559_p9 = scmp.lt.s32.totalorder %s698_s26, 12  ;;  %s241_s14 = sand.u32 1, %s694_s25  }
  0x10   : > { %p791_p10 = por %p200_p7, %p60_p0  ;;  %p795_p11 = por %p206_p8, %p66_p3 }
  0x11   : > { %s534_s15 = sshll.u32 %s698_s26, 3  ;;  %s533_s16 = sshll.u32 %s241_s14, 3 }
  0x12   : > { %s929_s1 = sld [smem:[#allocation10_spill]]  ;;  %s245_s21 = scalar_lea.vmem [#allocation4], %s533_s16 }
  0x13   : > { %s253_s22 = sshll.u32 %s245_s21, 4  ;;  %p806_p12 = pnand %p559_p9, %p781_p5  ;;  %s254_s22 = int_to_ptr.vmem [resolvable:$true] %s253_s22 }
  0x14   : > { %p535_p13 = scmp.ge.s32.totalorder %s698_s26, 1  ;;  %p258_p0 = scmp.lt.s32.totalorder %s698_s26, 13 }
  0x15   : > { %s242_s28 = scalar_lea.sflag [#allocation5], %s241_s14  ;;  %p606_p2 = pneg %p806_p12 }
  0x18   : > { %s249_s19 = scalar_lea.hbm %s929_s1, %s534_s15  ;;  %s609_s10 = scalar_lea.hbm %s929_s1, 96 }
  0x19   : > { %s251_s20 = sshll.u32 %s249_s19, 4  ;;  %s252_s20 = int_to_ptr.hbm [resolvable:$true] %s251_s20 }
  0x1a   : > { %s602_s30 = sshra.s32 %s252_s20, 4  ;;  %s603_s30 = int_to_ptr.hbm [resolvable:$true] %s602_s30 }
  0x1b   : > { %s604_s8 = scalar_lea.hbm %s603_s30, 8  ;;  %p610_p5 = scmp.lt.s32.totalorder %s603_s30, %s929_s1 }
  0x1c   : > { %p605_p1 = scmp.ne.s32.totalorder %s603_s30, %s604_s8  ;;  %p611_p7 = scmp.lt.s32.totalorder %s609_s10, %s604_s8 }
  0x1e   : > { %p607_p3 = pnand %p606_p2, %p605_p1  ;;  %p612_p8 = por %p611_p7, %p610_p5 }
  0x20   : > { %p608_p4 = pneg %p607_p3 }
  0x22   : > { %p613_p9 = pnand %p612_p8, %p608_p4 }
  0x24   : > { %616 = shalt.err (!%p613_p9)
}
  0x25   : > { %554 = dma.hbm_to_vmem [thread:$0]  (!%p806_p12), %s252_s20, 128, %s254_s22, %s242_s28  }
  0x26   : > { %p259_p1 = pnand %p535_p13, %p258_p0 }
  0x27   : > { %s827_s14 = sand.u32 (!%p259_p1), 1, %s690_s24  }
  0x28   : > { %262 = sbr.rel (%p259_p1) target bundleno = 473 (0x1d9), region = 44  ;;  %s536_s19 = sshll.u32 (!%p259_p1), %s827_s14, 3 }
  0x29   : > { %s265_s21 = scalar_lea.sflag (!%p259_p1), [#allocation5], %s827_s14  ;;  %s268_s30 = scalar_lea.vmem (!%p259_p1), [#allocation4], %s536_s19 }
  0x2d   : > { %677 = dma.done.wait (%p785_p6), %s265_s21, 128  }
  0x2e   : > { %679 = vsyncadd (%p785_p6), %s265_s21, 4294967168  ;;  %p304_p12 = scmp.lt.s32.totalorder %s763_s27, 11  ;;  %s842_s15 = scalar_lea.vmem [#allocation7], %s536_s19 }
  0x2f   : > { %p539_p13 = scmp.ne.s32.totalorder %s763_s27, 0 }
  0x30   : > { %s305_s20 = scalar_select %p304_p12, %s763_s27, 11 }
  0x31   : > { %311 = sbr.rel (%p539_p13) target bundleno = 171 (0xab), region = 52  ;;  %s700_s11 = smov (!%p539_p13), 16  }
  0x32   : > { %s538_s22 = sshll.u32 %s305_s20, 3 }
  0x33   : > { %s840_s8 = scalar_lea.vmem %s922_s6, %s538_s22 }
  0x36   : > { %v312_v0 = vld [vmem:[%s918_s2] sm:$0xff]  ;;  %vm317_vm0 = vcmask 392320  }
  0x37   : > { %314 = vrot.lane.b32.xlu0 %v312_v0, %s700_s11 }
  0xa9   : > { %v315_v1 = vpop.permute.xlu0 %314 }
  0xaa   : > { %318 = vst.msk [vmem:[#allocation2] sm:$0xff] %vm317_vm0, %v315_v1 }
  0xab PF: > { %v328_v2 = vld [vmem:[%s919_s3 + $0x28] sm:$0xff]  ;;  %v327_v3 = vld [vmem:[%s919_s3 + $0x20] sm:$0xff]  ;;  %vm320_vm1 = vcmask 130048   ;;  %v326_v4 = vld [vmem:[%s919_s3 + $0x18] sm:$0xff]  ;;  %vm333_vm2 = vcmask 392192   ;;  %vm364_vm3 = vcmask 261120  }
  0xac   : > { %347 = vmatpush.msra.mxu0 %v328_v2  ;;  %v319_v5 = vld [vmem:[%s268_s30] sm:$0xff]  ;;  %v323_v8 = vld [vmem:[%s919_s3] sm:$0xff]  ;;  %v369_v10 = vld [vmem:[%s921_s5 + $0x18] sm:$0xff]  ;;  %s701_s11 = smov 16   ;;  %s544_s17 = sshll.u32 %s763_s27, 3 }
  0xad   : > { %321 = vst.msk [vmem:[#allocation2] sm:$0xff] %vm320_vm1, %v319_v5  ;;  %v325_v6 = vld [vmem:[%s919_s3 + $0x10] sm:$0xff]  ;;  %v324_v7 = vld [vmem:[%s919_s3 + $0x8] sm:$0xff]  ;;  %384 = vmatpush.msra.mxu1 %v369_v10  ;;  %v366_v13 = vld [vmem:[%s921_s5] sm:$0xff]  ;;  %s431_s21 = scalar_lea.hbm %s923_s7, %s544_s17  ;;  %s433_s19 = sshll.u32 %s842_s15, 4  ;;  %s434_s19 = int_to_ptr.vmem [resolvable:$true] %s433_s19 }
  0xae   : > { %348 = vmatpush.msra.mxu0 %v327_v3  ;;  %v368_v11 = vld [vmem:[%s921_s5 + $0x10] sm:$0xff]  ;;  %v367_v12 = vld [vmem:[%s921_s5 + $0x8] sm:$0xff]  ;;  %v595_v14 = vld [vmem:[%s920_s4] ss:$0 sm:$0xff]  ;;  %s435_s20 = sshll.u32 %s431_s21, 4  ;;  %s418_s22 = scalar_lea.sflag [#allocation6], %s827_s14  ;;  %s436_s20 = int_to_ptr.hbm [resolvable:$true] %s435_s20 }
  0xaf   : > { %385 = vmatpush.msra.mxu1 %v368_v11  ;;  %s646_s0 = sshra.s32 %s436_s20, 4  ;;  %s652_s27 = scalar_lea.hbm %s923_s7, 96  ;;  %s647_s0 = int_to_ptr.hbm [resolvable:$true] %s646_s0 }
  0xb0   : > { %349 = vmatpush.msra.mxu0 %v326_v4  ;;  %s648_s28 = scalar_lea.hbm %s647_s0, 8  ;;  %p653_p3 = scmp.lt.s32.totalorder %s647_s0, %s923_s7 }
  0xb1   : > { %386 = vmatpush.msra.mxu1 %v367_v12  ;;  %p649_p6 = scmp.ne.s32.totalorder %s647_s0, %s648_s28  ;;  %p654_p4 = scmp.lt.s32.totalorder %s652_s27, %s648_s28 }
  0xb2   : > { %350 = vmatpush.msra.mxu0 %v325_v6 }
  0xb3   : > { %387 = vmatpush.msra.mxu1 %v366_v13  ;;  %p650_p0 = pnand %p649_p6, %p791_p10  ;;  %p655_p5 = por %p654_p4, %p653_p3 }
  0xb4   : > { %351 = vmatpush.msra.mxu0 %v324_v7  ;;  %v322_v9 = vld [vmem:[#allocation2] sm:$0xff] }
  0xb5   : > { %p651_p2 = pneg %p650_p0 }
  0xb6   : > { %352 = vmatpush.msra.mxu0 %v323_v8 }
  0xb7   : > { %540 = vmatmul.msk.f32.vlgmr.msra.gmra.mxu0 %vm333_vm2, %v322_v9  ;;  %p656_p7 = pnand %p655_p5, %p651_p2 }
 0x134   : > { %v354_v15 = vpop.f32.mrf.mxu0 }
 0x135   : > { %v355_v16 = vadd.f32 %v595_v14, %v354_v15 }
 0x137   : > { %596 = vtanh.f32 %v355_v16 }
 0x13d   : > { %v597_v17 = vpop.eup %596 }
 0x13e   : > { %359 = vrot.lane.b32.xlu0 %v597_v17, %s701_s11  ;;  %365 = vst.msk [vmem:[%s842_s15] sm:$0xff] %vm364_vm3, %v597_v17  ;;  %541 = vmatmul.msk.f32.vlgmr.msra.gmra.mxu1 %vm364_vm3, %v597_v17 }
 0x13f   : > { %659 = shalt.err (!%p656_p7)
}
 0x140   : > { %549 = dma.vmem_to_hbm [thread:$0]  (%p791_p10), %s434_s19, 128, %s436_s20, %s418_s22   ;;  %vm362_vm4 = vcmask 392320   ;;  %vm411_vm8 = vcmask 64512  }
 0x1b0   : > { %v360_v18 = vpop.permute.xlu0 %359 }
 0x1b1   : > { %363 = vst.msk [vmem:[#allocation2] sm:$0xff] %vm362_vm4, %v360_v18 }
 0x1bb   : > { %v389_v19 = vpop.f32.mrf.mxu1 }
 0x1bc   : > { %v542_v20 = vmul.f32 -1.442695, %v389_v19 }
 0x1be   : > { %598 = vpow2.f32 %v542_v20 }
 0x1c4   : > { %v599_v21 = vpop.eup %598 }
 0x1c5   : > { %v395_v22 = vadd.f32 1.0, %v599_v21 }
 0x1c7   : > { %600 = vrcp.f32 %v395_v22  ;;  %v407_v26 = vand.u32 2147483648, %v395_v22  ;;  %v405_v28 = vand.u32 2147483647, %v395_v22  ;;  %vm401_vm6 = vweird.f32 %v395_v22 }
 0x1c9   : > { %v408_v30 = vor.u32 1.1754944e-38, %v407_v26  ;;  %vm406_vm9 = vcmp.eq.f32.partialorder %v405_v28, 8.507059e+37 }
 0x1cd   : > { %v601_v23 = vpop.eup %600 }
 0x1ce   : > { %v397_v24 = vmul.f32 %v601_v23, %v395_v22  ;;  %vm402_vm5 = vweird.f32 %v601_v23 }
 0x1cf   : > { %vm403_vm7 = vmor %vm401_vm6, %vm402_vm5 }
 0x1d0   : > { %v398_v25 = vsub.f32 1.0, %v397_v24 }
 0x1d2   : > { %v399_v27 = vmul.f32 %v601_v23, %v398_v25 }
 0x1d4   : > { %v400_v29 = vadd.f32 %v601_v23, %v399_v27 }
 0x1d6   : > { %v404_v31 = vsel %vm403_vm7, %v601_v23, %v400_v29 }
 0x1d7   : > { %v409_v32 = vsel %vm406_vm9, %v408_v30, %v404_v31 }
 0x1d8   : > { %412 = vst.msk [vmem:[%s840_s8] sm:$0xff] %vm411_vm8, %v409_v32 }
 0x1d9 PF: > { %p560_p10 = scmp.ge.s32.totalorder %s698_s26, 2  ;;  %s454_s1 = sand.u32 1, %s686_s23  }
 0x1da   : > { %s455_s12 = scalar_lea.sflag [#allocation6], %s454_s1 }
 0x1db   : > { %p556_p8 = pnand %p560_p10, %p795_p11 }
 0x1dd   : > { %p557_p9 = pneg %p556_p8 }
 0x1df   : > { %681 = dma.done.wait (%p557_p9), %s455_s12, 128  }
 0x1e0   : > { %683 = vsyncadd (%p557_p9), %s455_s12, 4294967168  ;;  %p22_p1 = scmp.ge.s32.totalorder %s767_s29, 14   ;;  %s931_s23 = smov %s690_s24 }
 0x1e1   : > { %s932_s24 = smov %s694_s25  ;;  %s933_s25 = smov %s779_s9 }
 0x1e2   : > { %s934_s26 = smov %s767_s29  ;;  %24 = sbr.rel (!%p22_p1) target bundleno = 7 (0x7), region = 105 }
 0x1e7   :  { %461 = vsyncpa [#allocation5], 1 }
 0x1e8   :  { %463 = vsyncpa [#allocation5 + $0x1], 1 }
 0x1e9   :  { %464 = vsyncpa [#allocation6], 1 }
 0x1ea   :  { %466 = vsyncpa [#allocation6 + $0x1], 1 }

</bundles_post_ra>
